<compile_context>
chip_gen: v6e
topology: v6e:2x2x1
jax: 0.10.0
libtpu: 0.0.40
codegen_flags: <defaults>
</compile_context>

<pallas_src>
import math
from functools import partial

import jax
import jax.numpy as jnp
from jax import lax
from jax.experimental import pallas as pl
from jax.experimental.pallas import tpu as pltpu

LN_EPS = 1e-5
_NEG_BIG = -1e30  # finite "minus infinity" (avoids inf-inf NaNs with masking)


# --------------------------------------------------------------------------- #
# small shared helpers
# --------------------------------------------------------------------------- #
def _layer_norm(x, gamma, beta, eps=LN_EPS):
    mu = jnp.mean(x, axis=-1, keepdims=True)
    var = jnp.mean(jnp.square(x - mu), axis=-1, keepdims=True)
    return (x - mu) * lax.rsqrt(var + eps) * gamma + beta


def _gelu_tanh(x):
    c = math.sqrt(2.0 / math.pi)
    return 0.5 * x * (1.0 + jnp.tanh(c * (x + 0.044715 * x * x * x)))


def _round_up(x, m):
    return ((x + m - 1) // m) * m


def _seq_tile(n, target, align):
    """Row tile for the sequence axis (n is padded up to a multiple of it)."""
    if n <= target:
        return _round_up(n, align)
    return _round_up(target, align)


def _chunk(n, target, align):
    """Largest multiple of `align` <= target that divides n (else n itself)."""
    if n <= target:
        return n
    t = (min(target, n) // align) * align
    while t >= align:
        if n % t == 0:
            return t
        t -= align
    return n


def _heads_per_group(num_heads, head_dim):
    """Largest divisor of num_heads whose slab width (g*head_dim) fits 128 lanes."""
    best = 1
    for g in range(1, num_heads + 1):
        if num_heads % g == 0 and g * head_dim <= 128:
            best = g
    return best


def _padded_bytes(shape, dtype):
    s = list(shape)
    if len(s) >= 1:
        s[-1] = _round_up(s[-1], 128)      # lane padding
    if len(s) >= 2:
        s[-2] = _round_up(s[-2], 8)        # sublane padding
    return math.prod(s) * jnp.dtype(dtype).itemsize


def _vmem_limit(entries):
    """entries: iterable of (block_shape, dtype, n_buffers). Clamp [32, 48] MiB."""
    est = sum(_padded_bytes(s, d) * n for s, d, n in entries) + (12 << 20)
    return int(min(max(est, 32 << 20), 48 << 20))


def _const_spec(block_shape, single_buffer):
    """BlockSpec for a grid-constant operand (weights / biases / LN params)."""
    index_map = lambda *_: (0,) * len(block_shape)
    if single_buffer:
        return pl.BlockSpec(block_shape, index_map, pipeline_mode=pl.Buffered(1))
    return pl.BlockSpec(block_shape, index_map)


# --------------------------------------------------------------------------- #
# kernel 1: LayerNorm1 + QKV projection (scale already folded into w_qkv)
# --------------------------------------------------------------------------- #
def ln_qkv_kernel(x_ref, g_ref, b_ref, wqkv_ref, q_ref, k_ref, v_ref):
    x = x_ref[0].astype(jnp.float32)                           # (tr, C)
    C = x.shape[-1]
    xn = _layer_norm(x, g_ref[...], b_ref[...]).astype(wqkv_ref.dtype)
    qkv = jnp.dot(xn, wqkv_ref[...], preferred_element_type=jnp.float32)
    q_ref[0] = qkv[:, 0 * C:1 * C].astype(q_ref.dtype)
    k_ref[0] = qkv[:, 1 * C:2 * C].astype(k_ref.dtype)
    v_ref[0] = qkv[:, 2 * C:3 * C].astype(v_ref.dtype)


def ln_qkv_forward(x, g1, b1, w_qkv, *, seq_tile, single_buffer):
    B, N, C = x.shape
    tr = seq_tile
    grid = (B, N // tr)
    cd = x.dtype

    vmem = _vmem_limit([
        ((tr, C), cd, 2),
        ((1, C), jnp.float32, 4),
        ((C, 3 * C), cd, 1 if single_buffer else 2),
        ((tr, C), cd, 6),
    ])

    return pl.pallas_call(
        ln_qkv_kernel,
        out_shape=(jax.ShapeDtypeStruct((B, N, C), cd),) * 3,
        grid=grid,
        in_specs=[
            pl.BlockSpec((1, tr, C), lambda b, r: (b, r, 0)),
            _const_spec((1, C), single_buffer),
            _const_spec((1, C), single_buffer),
            _const_spec((C, 3 * C), single_buffer),
        ],
        out_specs=(
            pl.BlockSpec((1, tr, C), lambda b, r: (b, r, 0)),
            pl.BlockSpec((1, tr, C), lambda b, r: (b, r, 0)),
            pl.BlockSpec((1, tr, C), lambda b, r: (b, r, 0)),
        ),
        compiler_params=pltpu.CompilerParams(
            dimension_semantics=("parallel", "parallel"),
            vmem_limit_bytes=vmem),
    )(x, g1, b1, w_qkv)


# --------------------------------------------------------------------------- #
# kernel 2: flash attention (online softmax over kv tiles) + out proj + residual
# --------------------------------------------------------------------------- #
def flash_attn_kernel(x_ref, q_ref, k_ref, v_ref, wp_ref, bp_ref, o_ref,
                      m_ref, l_ref, acc_ref, *,
                      num_heads, heads_per_group, n_valid, mask_kv):
    ki = pl.program_id(2)
    n_kv = pl.num_programs(2)

    @pl.when(ki == 0)
    def _init():
        m_ref[...] = jnp.full(m_ref.shape, _NEG_BIG, dtype=m_ref.dtype)
        l_ref[...] = jnp.zeros(l_ref.shape, dtype=l_ref.dtype)
        acc_ref[...] = jnp.zeros(acc_ref.shape, dtype=acc_ref.dtype)

    q = q_ref[0]                        # (tq, C)  bf16, scale already folded in
    k = k_ref[0]                        # (tkv, C)
    v = v_ref[0]                        # (tkv, C)
    C = q.shape[-1]
    hd = C // num_heads
    hpg = heads_per_group
    gw = hpg * hd
    n_groups = num_heads // hpg
    tq = q.shape[0]
    tkv = k.shape[0]

    if mask_kv:
        col = lax.broadcasted_iota(jnp.int32, (1, tkv), 1)
        kv_valid = (ki * tkv + col) < n_valid            # (1, tkv) bool

    for g in range(n_groups):                            # 128-lane-wide head groups
        c0 = g * gw
        acc_old = acc_ref[:, c0:c0 + gw]                 # (tq, gw) f32, one load
        parts = []
        for j in range(hpg):
            h = g * hpg + j
            hs = slice(c0 + j * hd, c0 + (j + 1) * hd)
            s = lax.dot_general(q[:, hs], k[:, hs],
                                dimension_numbers=(((1,), (1,)), ((), ())),
                                preferred_element_type=jnp.float32)   # (tq, tkv)
            if mask_kv:
                s = jnp.where(kv_valid, s, _NEG_BIG)
            m_prev = m_ref[h]                                         # (tq, 1)
            m_new = jnp.maximum(m_prev, jnp.max(s, axis=-1, keepdims=True))
            alpha = jnp.exp(m_prev - m_new)
            p = jnp.exp(s - m_new)
            l_ref[h] = alpha * l_ref[h] + jnp.sum(p, axis=-1, keepdims=True)
            m_ref[h] = m_new
            pv = jnp.dot(p.astype(v.dtype), v[:, hs],
                         preferred_element_type=jnp.float32)          # (tq, hd)
            parts.append(alpha * acc_old[:, j * hd:(j + 1) * hd] + pv)
        # single unmasked, lane-aligned store per group per kv step
        acc_ref[:, c0:c0 + gw] = parts[0] if hpg == 1 else jnp.concatenate(parts, -1)

    @pl.when(ki == n_kv - 1)
    def _finalize():
        y = None
        for g in range(n_groups):
            c0 = g * gw
            inv_parts = [jnp.broadcast_to(1.0 / l_ref[g * hpg + j], (tq, hd))
                         for j in range(hpg)]
            inv = inv_parts[0] if hpg == 1 else jnp.concatenate(inv_parts, -1)
            slab = (acc_ref[:, c0:c0 + gw] * inv).astype(wp_ref.dtype)
            part = jnp.dot(slab, wp_ref[c0:c0 + gw, :],
                           preferred_element_type=jnp.float32)        # (tq, C)
            y = part if y is None else y + part
        y = y + bp_ref[...]
        o_ref[0] = (x_ref[0].astype(jnp.float32) + y).astype(o_ref.dtype)


def attn_residual_forward(x, q, k, v, w_proj, b_proj, *, num_heads, n_valid,
                          seq_tile, single_buffer):
    B, N, C = x.shape
    tq = tkv = seq_tile
    grid = (B, N // tq, N // tkv)
    cd = x.dtype
    hd = C // num_heads
    hpg = _heads_per_group(num_heads, hd)
    mask_kv = n_valid < N

    scratch = [
        pltpu.VMEM((num_heads, tq, 1), jnp.float32),   # running max m
        pltpu.VMEM((num_heads, tq, 1), jnp.float32),   # running denom l
        pltpu.VMEM((tq, C), jnp.float32),              # lane-dense PV accumulator
    ]
    vmem = _vmem_limit([
        ((tq, C), cd, 4),                              # x, q blocks (double buffered)
        ((tkv, C), cd, 4),                             # k, v blocks
        ((C, C), cd, 1 if single_buffer else 2),
        ((1, C), jnp.float32, 2),
        ((tq, C), cd, 2),                              # out block
        ((num_heads, tq, 1), jnp.float32, 2),          # m, l (lane-padded)
        ((tq, C), jnp.float32, 1),                     # acc
    ])

    kern = partial(flash_attn_kernel, num_heads=num_heads, heads_per_group=hpg,
                   n_valid=n_valid, mask_kv=mask_kv)

    return pl.pallas_call(
        kern,
        out_shape=jax.ShapeDtypeStruct((B, N, C), cd),
        grid=grid,
        in_specs=[
            pl.BlockSpec((1, tq, C), lambda b, qi, ki: (b, qi, 0)),    # residual x
            pl.BlockSpec((1, tq, C), lambda b, qi, ki: (b, qi, 0)),    # q
            pl.BlockSpec((1, tkv, C), lambda b, qi, ki: (b, ki, 0)),   # k
            pl.BlockSpec((1, tkv, C), lambda b, qi, ki: (b, ki, 0)),   # v
            _const_spec((C, C), single_buffer),                        # w_proj
            _const_spec((1, C), single_buffer),                        # b_proj
        ],
        out_specs=pl.BlockSpec((1, tq, C), lambda b, qi, ki: (b, qi, 0)),
        scratch_shapes=scratch,
        compiler_params=pltpu.CompilerParams(
            dimension_semantics=("parallel", "parallel", "arbitrary"),
            vmem_limit_bytes=vmem),
    )(x, q, k, v, w_proj, b_proj)


# --------------------------------------------------------------------------- #
# kernel 3: LayerNorm2 + MLP (GELU) + residual, hidden dim tiled / streamed
# --------------------------------------------------------------------------- #
def ln_mlp_kernel(x_ref, g_ref, b_ref, w1_ref, b1_ref, w2_ref, b2_ref, o_ref,
                  xn_ref, acc_ref):
    hi = pl.program_id(2)
    n_h = pl.num_programs(2)

    @pl.when(hi == 0)
    def _init():
        x = x_ref[0].astype(jnp.float32)
        xn = _layer_norm(x, g_ref[...], b_ref[...])
        xn_ref[...] = xn.astype(xn_ref.dtype)
        acc_ref[...] = jnp.zeros(acc_ref.shape, dtype=acc_ref.dtype)

    h = jnp.dot(xn_ref[...], w1_ref[...],
                preferred_element_type=jnp.float32) + b1_ref[...]
    h = _gelu_tanh(h)
    acc_ref[...] += jnp.dot(h.astype(w2_ref.dtype), w2_ref[...],
                            preferred_element_type=jnp.float32)

    @pl.when(hi == n_h - 1)
    def _finalize():
        o_ref[0] = (x_ref[0].astype(jnp.float32) + acc_ref[...]
                    + b2_ref[...]).astype(o_ref.dtype)


def ln_mlp_forward(x, g2, b2, w_fc1, b_fc1, w_fc2, b_fc2, *, seq_tile,
                   hidden_tile, out_dtype, single_buffer):
    B, N, C = x.shape
    Hm = w_fc1.shape[1]
    tr = seq_tile
    th = _chunk(Hm, hidden_tile, 128)
    grid = (B, N // tr, Hm // th)
    cd = x.dtype

    scratch = [pltpu.VMEM((tr, C), cd),            # LN output, reused per chunk
               pltpu.VMEM((tr, C), jnp.float32)]   # fc2 accumulator
    vmem = _vmem_limit([
        ((tr, C), cd, 2),
        ((1, C), jnp.float32, 6),
        ((C, th), cd, 2),
        ((1, th), jnp.float32, 2),
        ((th, C), cd, 2),
        ((tr, C), out_dtype, 2),
        ((tr, C), cd, 1),
        ((tr, C), jnp.float32, 1),
    ])

    return pl.pallas_call(
        ln_mlp_kernel,
        out_shape=jax.ShapeDtypeStruct((B, N, C), out_dtype),
        grid=grid,
        in_specs=[
            pl.BlockSpec((1, tr, C), lambda b, r, h: (b, r, 0)),   # x (resident over h)
            _const_spec((1, C), single_buffer),                    # gamma2
            _const_spec((1, C), single_buffer),                    # beta2
            pl.BlockSpec((C, th), lambda b, r, h: (0, h)),         # w_fc1 column tile
            pl.BlockSpec((1, th), lambda b, r, h: (0, h)),         # b_fc1 tile
            pl.BlockSpec((th, C), lambda b, r, h: (h, 0)),         # w_fc2 row tile
            _const_spec((1, C), single_buffer),                    # b_fc2
        ],
        out_specs=pl.BlockSpec((1, tr, C), lambda b, r, h: (b, r, 0)),
        scratch_shapes=scratch,
        compiler_params=pltpu.CompilerParams(
            dimension_semantics=("parallel", "parallel", "arbitrary"),
            vmem_limit_bytes=vmem),
    )(x, g2, b2, w_fc1, b_fc1, w_fc2, b_fc2)


# --------------------------------------------------------------------------- #
# full Block forward
# --------------------------------------------------------------------------- #
def _block_forward(x, p, *, num_heads, compute_dtype, seq_target, hidden_target,
                   single_buffer):
    B, N, C = x.shape
    assert C % num_heads == 0
    hd = C // num_heads
    scale = hd ** -0.5
    cd = jnp.dtype(compute_dtype)
    f32 = jnp.float32

    row_align = 8 * (4 // cd.itemsize)            # 8 for f32, 16 for bf16
    ts = _seq_tile(N, seq_target, row_align)
    n_pad = _round_up(N, ts)

    xc = x.astype(cd)
    if n_pad != N:
        xc = jnp.pad(xc, ((0, 0), (0, n_pad - N), (0, 0)))

    # fold the softmax scale into the Q columns of w_qkv (one-time constant fold)
    w_qkv = jnp.concatenate([p["w_qkv"][:, :C] * scale, p["w_qkv"][:, C:]],
                            axis=-1).astype(cd)
    w_proj = p["w_proj"].astype(cd)
    w_fc1 = p["w_fc1"].astype(cd)
    w_fc2 = p["w_fc2"].astype(cd)
    g1 = p["g1"].reshape(1, C).astype(f32)
    b1 = p["b1"].reshape(1, C).astype(f32)
    g2 = p["g2"].reshape(1, C).astype(f32)
    b2 = p["b2"].reshape(1, C).astype(f32)
    b_proj = p["b_proj"].reshape(1, C).astype(f32)
    b_fc1 = p["b_fc1"].reshape(1, -1).astype(f32)
    b_fc2 = p["b_fc2"].reshape(1, C).astype(f32)

    q, k, v = ln_qkv_forward(xc, g1, b1, w_qkv,
                             seq_tile=ts, single_buffer=single_buffer)
    y = attn_residual_forward(xc, q, k, v, w_proj, b_proj, num_heads=num_heads,
                              n_valid=N, seq_tile=ts, single_buffer=single_buffer)
    out = ln_mlp_forward(y, g2, b2, w_fc1, b_fc1, w_fc2, b_fc2,
                         seq_tile=ts, hidden_tile=hidden_target,
                         out_dtype=x.dtype, single_buffer=single_buffer)
    if n_pad != N:
        out = out[:, :N, :]
    return out


def block_forward(x, p, *, num_heads, compute_dtype=jnp.bfloat16,
                  seq_tile=256, hidden_tile=512):
    kwargs = dict(num_heads=num_heads, compute_dtype=compute_dtype,
                  seq_target=seq_tile, hidden_target=hidden_tile)
    try:
        return _block_forward(x, p, single_buffer=True, **kwargs)
    except Exception:
        # pl.Buffered(1) not accepted on this jax build -> default double buffering
        return _block_forward(x, p, single_buffer=False, **kwargs)


# --------------------------------------------------------------------------- #
# pure-JAX reference (matmul_dtype=None -> exact f32 mirror of the torch Block;
# matmul_dtype=bf16 -> emulates the kernel's mixed precision rounding points)
# --------------------------------------------------------------------------- #
def block_reference(x, p, *, num_heads, matmul_dtype=None):
    f32 = jnp.float32
    cd = f32 if matmul_dtype is None else matmul_dtype
    c = lambda a: a.astype(cd)
    mm = lambda a, b: jnp.dot(c(a), c(b), preferred_element_type=f32)

    B, N, C = x.shape
    hd = C // num_heads
    scale = hd ** -0.5

    def ln(t, g, b):
        mu = t.mean(-1, keepdims=True)
        var = ((t - mu) ** 2).mean(-1, keepdims=True)
        return (t - mu) / jnp.sqrt(var + LN_EPS) * g + b

    x0 = c(x).astype(f32)
    qkv = mm(ln(x0, p["g1"], p["b1"]), p["w_qkv"])
    qkv = qkv.reshape(B, N, 3, num_heads, hd).transpose(2, 0, 3, 1, 4)
    q, k, v = c(qkv[0] * scale), c(qkv[1]), c(qkv[2])        # (B, H, N, hd)
    s = jnp.einsum("bhqd,bhkd->bhqk", q, k, preferred_element_type=f32)
    attn = jax.nn.softmax(s, axis=-1)
    av = jnp.einsum("bhqk,bhkd->bhqd", c(attn), v, preferred_element_type=f32)
    av = av.transpose(0, 2, 1, 3).reshape(B, N, C)
    y = (x0 + mm(av, p["w_proj"]) + p["b_proj"]).astype(cd).astype(f32)
    h = _gelu_tanh(mm(ln(y, p["g2"], p["b2"]), p["w_fc1"]) + p["b_fc1"])
    out = y + mm(h, p["w_fc2"]) + p["b_fc2"]
    return out.astype(x.dtype)


if __name__ == "__main__":
    B, N, C = 2, 8, 32
    num_heads = 4
    mlp_ratio = 4.0
    Hm = int(C * mlp_ratio)

    key = jax.random.PRNGKey(0)
    ks = jax.random.split(key, 11)
    x = jax.random.normal(ks[0], (B, N, C), dtype=jnp.float32)
    params = dict(
        g1=1.0 + 0.1 * jax.random.normal(ks[1], (C,), dtype=jnp.float32),
        b1=0.1 * jax.random.normal(ks[2], (C,), dtype=jnp.float32),
        w_qkv=jax.random.normal(ks[3], (C, 3 * C), dtype=jnp.float32) * C ** -0.5,
        w_proj=jax.random.normal(ks[4], (C, C), dtype=jnp.float32) * C ** -0.5,
        b_proj=0.02 * jax.random.normal(ks[5], (C,), dtype=jnp.float32),
        g2=1.0 + 0.1 * jax.random.normal(ks[6], (C,), dtype=jnp.float32),
        b2=0.1 * jax.random.normal(ks[7], (C,), dtype=jnp.float32),
        w_fc1=jax.random.normal(ks[8], (C, Hm), dtype=jnp.float32) * C ** -0.5,
        b_fc1=0.02 * jax.random.normal(ks[9], (Hm,), dtype=jnp.float32),
        w_fc2=jax.random.normal(ks[10], (Hm, C), dtype=jnp.float32) * Hm ** -0.5,
        b_fc2=jnp.zeros((C,), dtype=jnp.float32),
    )

    out = block_forward(x, params, num_heads=num_heads)       # bf16 matmul path
    out = jax.block_until_ready(out)
    assert out.shape == (B, N, C) and out.dtype == x.dtype

    # tight check vs a precision-matched (bf16 operands / f32 accumulation) ref
    ref_bf16 = block_reference(x, params, num_heads=num_heads,
                               matmul_dtype=jnp.bfloat16)
    err_m = float(jnp.max(jnp.abs(out - ref_bf16)))
    assert jnp.allclose(out, ref_bf16, rtol=3e-2, atol=3e-2), \
        f"mismatch vs bf16-matched reference (max abs err {err_m})"

    # loose sanity check vs the full-f32 mirror of the PyTorch module
    ref_f32 = block_reference(x, params, num_heads=num_heads)
    err_f = float(jnp.max(jnp.abs(out - ref_f32)))
    assert jnp.allclose(out, ref_f32, rtol=1e-1, atol=2.5e-1), \
        f"mismatch vs f32 reference (max abs err {err_f})"

    print("KERNEL_OK")
</pallas_src>

<mosaic_0001>
module attributes {stable_mosaic.version = 11 : i64} {
  func.func @ln_qkv_kernel(%arg0: i32, %arg1: i32, %arg2: memref<1x16x32xbf16, #tpu.memory_space<vmem>>, %arg3: memref<1x32xf32, #tpu.memory_space<vmem>>, %arg4: memref<1x32xf32, #tpu.memory_space<vmem>>, %arg5: memref<32x96xbf16, #tpu.memory_space<vmem>>, %arg6: memref<1x16x32xbf16, #tpu.memory_space<vmem>>, %arg7: memref<1x16x32xbf16, #tpu.memory_space<vmem>>, %arg8: memref<1x16x32xbf16, #tpu.memory_space<vmem>>) attributes {dimension_semantics = [#tpu.dimension_semantics<parallel>, #tpu.dimension_semantics<parallel>], iteration_bounds = array<i64: 2, 1>, scalar_prefetch = 0 : i64, scratch_operands = 0 : i64, tpu.core_type = #tpu.core_type<tc>, window_params = [{transform_indices = @transform_0, window_bounds = array<i64: 1, 16, 32>}, {pipeline_mode = #tpu.pipeline_mode<synchronous>, transform_indices = @transform_1, window_bounds = array<i64: 1, 32>}, {pipeline_mode = #tpu.pipeline_mode<synchronous>, transform_indices = @transform_2, window_bounds = array<i64: 1, 32>}, {pipeline_mode = #tpu.pipeline_mode<synchronous>, transform_indices = @transform_3, window_bounds = array<i64: 32, 96>}, {transform_indices = @transform_4, window_bounds = array<i64: 1, 16, 32>}, {transform_indices = @transform_5, window_bounds = array<i64: 1, 16, 32>}, {transform_indices = @transform_6, window_bounds = array<i64: 1, 16, 32>}]} {
    %c0 = arith.constant 0 : index
    %c0_0 = arith.constant 0 : index
    %c0_1 = arith.constant 0 : index
    %0 = vector.load %arg2[%c0, %c0_0, %c0_1] : memref<1x16x32xbf16, #tpu.memory_space<vmem>>, vector<1x16x32xbf16>
    %1 = vector.shape_cast %0 : vector<1x16x32xbf16> to vector<16x32xbf16>
    %2 = arith.extf %1 : vector<16x32xbf16> to vector<16x32xf32>
    %c0_2 = arith.constant 0 : index
    %c0_3 = arith.constant 0 : index
    %3 = vector.load %arg3[%c0_2, %c0_3] : memref<1x32xf32, #tpu.memory_space<vmem>>, vector<1x32xf32>
    %c0_4 = arith.constant 0 : index
    %c0_5 = arith.constant 0 : index
    %4 = vector.load %arg4[%c0_4, %c0_5] : memref<1x32xf32, #tpu.memory_space<vmem>>, vector<1x32xf32>
    %cst = arith.constant dense<0.000000e+00> : vector<16xf32>
    %5 = vector.multi_reduction <add>, %2, %cst [1] : vector<16x32xf32> to vector<16xf32>
    %6 = vector.shape_cast %5 : vector<16xf32> to vector<16x1xf32>
    %cst_6 = arith.constant 3.200000e+01 : f32
    %7 = vector.broadcast %cst_6 : f32 to vector<16x1xf32>
    %8 = arith.divf %6, %7 : vector<16x1xf32>
    %9 = vector.broadcast %8 : vector<16x1xf32> to vector<16x32xf32>
    %10 = arith.subf %2, %9 : vector<16x32xf32>
    %11 = arith.mulf %10, %10 : vector<16x32xf32>
    %cst_7 = arith.constant dense<0.000000e+00> : vector<16xf32>
    %12 = vector.multi_reduction <add>, %11, %cst_7 [1] : vector<16x32xf32> to vector<16xf32>
    %13 = vector.shape_cast %12 : vector<16xf32> to vector<16x1xf32>
    %cst_8 = arith.constant 3.200000e+01 : f32
    %14 = vector.broadcast %cst_8 : f32 to vector<16x1xf32>
    %15 = arith.divf %13, %14 : vector<16x1xf32>
    %16 = vector.broadcast %8 : vector<16x1xf32> to vector<16x32xf32>
    %17 = arith.subf %2, %16 : vector<16x32xf32>
    %cst_9 = arith.constant 9.99999974E-6 : f32
    %18 = vector.broadcast %cst_9 : f32 to vector<16x1xf32>
    %19 = arith.addf %15, %18 : vector<16x1xf32>
    %20 = math.rsqrt %19 : vector<16x1xf32>
    %21 = vector.broadcast %20 : vector<16x1xf32> to vector<16x32xf32>
    %22 = arith.mulf %17, %21 : vector<16x32xf32>
    %23 = vector.broadcast %3 : vector<1x32xf32> to vector<16x32xf32>
    %24 = arith.mulf %22, %23 : vector<16x32xf32>
    %25 = vector.broadcast %4 : vector<1x32xf32> to vector<16x32xf32>
    %26 = arith.addf %24, %25 : vector<16x32xf32>
    %27 = arith.truncf %26 : vector<16x32xf32> to vector<16x32xbf16>
    %c0_10 = arith.constant 0 : index
    %c0_11 = arith.constant 0 : index
    %28 = vector.load %arg5[%c0_10, %c0_11] : memref<32x96xbf16, #tpu.memory_space<vmem>>, vector<32x96xbf16>
    %cst_12 = arith.constant dense<0.000000e+00> : vector<16x96xf32>
    %29 = tpu.matmul %27, %28, %cst_12 {dimension_numbers = #tpu.dot_dimension_numbers<[1], [0], [0], [1], [0, 0, 1, 1], [], []>} : vector<16x32xbf16>, vector<32x96xbf16>, vector<16x96xf32> -> vector<16x96xf32>
    %30 = vector.extract_strided_slice %29 {offsets = [0, 0], sizes = [16, 32], strides = [1, 1]} : vector<16x96xf32> to vector<16x32xf32>
    %31 = arith.truncf %30 : vector<16x32xf32> to vector<16x32xbf16>
    %c0_13 = arith.constant 0 : index
    %c0_14 = arith.constant 0 : index
    %c0_15 = arith.constant 0 : index
    %32 = vector.load %arg6[%c0_13, %c0_14, %c0_15] : memref<1x16x32xbf16, #tpu.memory_space<vmem>>, vector<1x16x32xbf16>
    %33 = vector.shape_cast %32 : vector<1x16x32xbf16> to vector<16x32xbf16>
    %34 = vector.shape_cast %31 : vector<16x32xbf16> to vector<1x16x32xbf16>
    tpu.vector_store %arg6[%c0_13, %c0_14, %c0_15], %34 {strides = array<i32>} : memref<1x16x32xbf16, #tpu.memory_space<vmem>>, vector<1x16x32xbf16>,
    %35 = vector.extract_strided_slice %29 {offsets = [0, 32], sizes = [16, 32], strides = [1, 1]} : vector<16x96xf32> to vector<16x32xf32>
    %36 = arith.truncf %35 : vector<16x32xf32> to vector<16x32xbf16>
    %c0_16 = arith.constant 0 : index
    %c0_17 = arith.constant 0 : index
    %c0_18 = arith.constant 0 : index
    %37 = vector.load %arg7[%c0_16, %c0_17, %c0_18] : memref<1x16x32xbf16, #tpu.memory_space<vmem>>, vector<1x16x32xbf16>
    %38 = vector.shape_cast %37 : vector<1x16x32xbf16> to vector<16x32xbf16>
    %39 = vector.shape_cast %36 : vector<16x32xbf16> to vector<1x16x32xbf16>
    tpu.vector_store %arg7[%c0_16, %c0_17, %c0_18], %39 {strides = array<i32>} : memref<1x16x32xbf16, #tpu.memory_space<vmem>>, vector<1x16x32xbf16>,
    %40 = vector.extract_strided_slice %29 {offsets = [0, 64], sizes = [16, 32], strides = [1, 1]} : vector<16x96xf32> to vector<16x32xf32>
    %41 = arith.truncf %40 : vector<16x32xf32> to vector<16x32xbf16>
    %c0_19 = arith.constant 0 : index
    %c0_20 = arith.constant 0 : index
    %c0_21 = arith.constant 0 : index
    %42 = vector.load %arg8[%c0_19, %c0_20, %c0_21] : memref<1x16x32xbf16, #tpu.memory_space<vmem>>, vector<1x16x32xbf16>
    %43 = vector.shape_cast %42 : vector<1x16x32xbf16> to vector<16x32xbf16>
    %44 = vector.shape_cast %41 : vector<16x32xbf16> to vector<1x16x32xbf16>
    tpu.vector_store %arg8[%c0_19, %c0_20, %c0_21], %44 {strides = array<i32>} : memref<1x16x32xbf16, #tpu.memory_space<vmem>>, vector<1x16x32xbf16>,
    return
  }
  func.func @transform_0(%arg0: i32, %arg1: i32) -> (i32, i32, i32) {
    %c0_i32 = arith.constant 0 : i32
    %c0_i32_0 = arith.constant 0 : i32
    return %arg0, %arg1, %c0_i32 : i32, i32, i32
  }
  func.func @transform_1(%arg0: i32, %arg1: i32) -> (i32, i32) {
    %c0_i32 = arith.constant 0 : i32
    %c0_i32_0 = arith.constant 0 : i32
    %c0_i32_1 = arith.constant 0 : i32
    return %c0_i32, %c0_i32_0 : i32, i32
  }
  func.func @transform_2(%arg0: i32, %arg1: i32) -> (i32, i32) {
    %c0_i32 = arith.constant 0 : i32
    %c0_i32_0 = arith.constant 0 : i32
    %c0_i32_1 = arith.constant 0 : i32
    return %c0_i32, %c0_i32_0 : i32, i32
  }
  func.func @transform_3(%arg0: i32, %arg1: i32) -> (i32, i32) {
    %c0_i32 = arith.constant 0 : i32
    %c0_i32_0 = arith.constant 0 : i32
    %c0_i32_1 = arith.constant 0 : i32
    return %c0_i32, %c0_i32_0 : i32, i32
  }
  func.func @transform_4(%arg0: i32, %arg1: i32) -> (i32, i32, i32) {
    %c0_i32 = arith.constant 0 : i32
    %c0_i32_0 = arith.constant 0 : i32
    return %arg0, %arg1, %c0_i32 : i32, i32, i32
  }
  func.func @transform_5(%arg0: i32, %arg1: i32) -> (i32, i32, i32) {
    %c0_i32 = arith.constant 0 : i32
    %c0_i32_0 = arith.constant 0 : i32
    return %arg0, %arg1, %c0_i32 : i32, i32, i32
  }
  func.func @transform_6(%arg0: i32, %arg1: i32) -> (i32, i32, i32) {
    %c0_i32 = arith.constant 0 : i32
    %c0_i32_0 = arith.constant 0 : i32
    return %arg0, %arg1, %c0_i32 : i32, i32, i32
  }
}

module attributes {stable_mosaic.version = 11 : i64} {
  func.func @ln_qkv_kernel(%arg0: i32, %arg1: i32, %arg2: memref<1x16x32xbf16, #tpu.memory_space<vmem>>, %arg3: memref<1x32xf32, #tpu.memory_space<vmem>>, %arg4: memref<1x32xf32, #tpu.memory_space<vmem>>, %arg5: memref<32x96xbf16, #tpu.memory_space<vmem>>, %arg6: memref<1x16x32xbf16, #tpu.memory_space<vmem>>, %arg7: memref<1x16x32xbf16, #tpu.memory_space<vmem>>, %arg8: memref<1x16x32xbf16, #tpu.memory_space<vmem>>) attributes {dimension_semantics = [#tpu.dimension_semantics<parallel>, #tpu.dimension_semantics<parallel>], iteration_bounds = array<i64: 2, 1>, scalar_prefetch = 0 : i64, scratch_operands = 0 : i64, tpu.core_type = #tpu.core_type<tc>, window_params = [{transform_indices = @transform_0, window_bounds = array<i64: 1, 16, 32>}, {pipeline_mode = #tpu.pipeline_mode<synchronous>, transform_indices = @transform_1, window_bounds = array<i64: 1, 32>}, {pipeline_mode = #tpu.pipeline_mode<synchronous>, transform_indices = @transform_2, window_bounds = array<i64: 1, 32>}, {pipeline_mode = #tpu.pipeline_mode<synchronous>, transform_indices = @transform_3, window_bounds = array<i64: 32, 96>}, {transform_indices = @transform_4, window_bounds = array<i64: 1, 16, 32>}, {transform_indices = @transform_5, window_bounds = array<i64: 1, 16, 32>}, {transform_indices = @transform_6, window_bounds = array<i64: 1, 16, 32>}]} {
    %c0 = arith.constant 0 : index
    %c0_0 = arith.constant 0 : index
    %c0_1 = arith.constant 0 : index
    %0 = vector.load %arg2[%c0, %c0_0, %c0_1] : memref<1x16x32xbf16, #tpu.memory_space<vmem>>, vector<1x16x32xbf16>
    %1 = vector.shape_cast %0 : vector<1x16x32xbf16> to vector<16x32xbf16>
    %2 = arith.extf %1 : vector<16x32xbf16> to vector<16x32xf32>
    %c0_2 = arith.constant 0 : index
    %c0_3 = arith.constant 0 : index
    %3 = vector.load %arg3[%c0_2, %c0_3] : memref<1x32xf32, #tpu.memory_space<vmem>>, vector<1x32xf32>
    %c0_4 = arith.constant 0 : index
    %c0_5 = arith.constant 0 : index
    %4 = vector.load %arg4[%c0_4, %c0_5] : memref<1x32xf32, #tpu.memory_space<vmem>>, vector<1x32xf32>
    %cst = arith.constant dense<0.000000e+00> : vector<16xf32>
    %5 = vector.multi_reduction <add>, %2, %cst [1] : vector<16x32xf32> to vector<16xf32>
    %6 = vector.shape_cast %5 : vector<16xf32> to vector<16x1xf32>
    %cst_6 = arith.constant 3.200000e+01 : f32
    %7 = vector.broadcast %cst_6 : f32 to vector<16x1xf32>
    %8 = arith.divf %6, %7 : vector<16x1xf32>
    %9 = vector.broadcast %8 : vector<16x1xf32> to vector<16x32xf32>
    %10 = arith.subf %2, %9 : vector<16x32xf32>
    %11 = arith.mulf %10, %10 : vector<16x32xf32>
    %cst_7 = arith.constant dense<0.000000e+00> : vector<16xf32>
    %12 = vector.multi_reduction <add>, %11, %cst_7 [1] : vector<16x32xf32> to vector<16xf32>
    %13 = vector.shape_cast %12 : vector<16xf32> to vector<16x1xf32>
    %cst_8 = arith.constant 3.200000e+01 : f32
    %14 = vector.broadcast %cst_8 : f32 to vector<16x1xf32>
    %15 = arith.divf %13, %14 : vector<16x1xf32>
    %16 = vector.broadcast %8 : vector<16x1xf32> to vector<16x32xf32>
    %17 = arith.subf %2, %16 : vector<16x32xf32>
    %cst_9 = arith.constant 9.99999974E-6 : f32
    %18 = vector.broadcast %cst_9 : f32 to vector<16x1xf32>
    %19 = arith.addf %15, %18 : vector<16x1xf32>
    %20 = math.rsqrt %19 : vector<16x1xf32>
    %21 = vector.broadcast %20 : vector<16x1xf32> to vector<16x32xf32>
    %22 = arith.mulf %17, %21 : vector<16x32xf32>
    %23 = vector.broadcast %3 : vector<1x32xf32> to vector<16x32xf32>
    %24 = arith.mulf %22, %23 : vector<16x32xf32>
    %25 = vector.broadcast %4 : vector<1x32xf32> to vector<16x32xf32>
    %26 = arith.addf %24, %25 : vector<16x32xf32>
    %27 = arith.truncf %26 : vector<16x32xf32> to vector<16x32xbf16>
    %c0_10 = arith.constant 0 : index
    %c0_11 = arith.constant 0 : index
    %28 = vector.load %arg5[%c0_10, %c0_11] : memref<32x96xbf16, #tpu.memory_space<vmem>>, vector<32x96xbf16>
    %cst_12 = arith.constant dense<0.000000e+00> : vector<16x96xf32>
    %29 = tpu.matmul %27, %28, %cst_12 {dimension_numbers = #tpu.dot_dimension_numbers<[1], [0], [0], [1], [0, 0, 1, 1], [], []>} : vector<16x32xbf16>, vector<32x96xbf16>, vector<16x96xf32> -> vector<16x96xf32>
    %30 = vector.extract_strided_slice %29 {offsets = [0, 0], sizes = [16, 32], strides = [1, 1]} : vector<16x96xf32> to vector<16x32xf32>
    %31 = arith.truncf %30 : vector<16x32xf32> to vector<16x32xbf16>
    %c0_13 = arith.constant 0 : index
    %c0_14 = arith.constant 0 : index
    %c0_15 = arith.constant 0 : index
    %32 = vector.load %arg6[%c0_13, %c0_14, %c0_15] : memref<1x16x32xbf16, #tpu.memory_space<vmem>>, vector<1x16x32xbf16>
    %33 = vector.shape_cast %32 : vector<1x16x32xbf16> to vector<16x32xbf16>
    %34 = vector.shape_cast %31 : vector<16x32xbf16> to vector<1x16x32xbf16>
    tpu.vector_store %arg6[%c0_13, %c0_14, %c0_15], %34 {strides = array<i32>} : memref<1x16x32xbf16, #tpu.memory_space<vmem>>, vector<1x16x32xbf16>,
    %35 = vector.extract_strided_slice %29 {offsets = [0, 32], sizes = [16, 32], strides = [1, 1]} : vector<16x96xf32> to vector<16x32xf32>
    %36 = arith.truncf %35 : vector<16x32xf32> to vector<16x32xbf16>
    %c0_16 = arith.constant 0 : index
    %c0_17 = arith.constant 0 : index
    %c0_18 = arith.constant 0 : index
    %37 = vector.load %arg7[%c0_16, %c0_17, %c0_18] : memref<1x16x32xbf16, #tpu.memory_space<vmem>>, vector<1x16x32xbf16>
    %38 = vector.shape_cast %37 : vector<1x16x32xbf16> to vector<16x32xbf16>
    %39 = vector.shape_cast %36 : vector<16x32xbf16> to vector<1x16x32xbf16>
    tpu.vector_store %arg7[%c0_16, %c0_17, %c0_18], %39 {strides = array<i32>} : memref<1x16x32xbf16, #tpu.memory_space<vmem>>, vector<1x16x32xbf16>,
    %40 = vector.extract_strided_slice %29 {offsets = [0, 64], sizes = [16, 32], strides = [1, 1]} : vector<16x96xf32> to vector<16x32xf32>
    %41 = arith.truncf %40 : vector<16x32xf32> to vector<16x32xbf16>
    %c0_19 = arith.constant 0 : index
    %c0_20 = arith.constant 0 : index
    %c0_21 = arith.constant 0 : index
    %42 = vector.load %arg8[%c0_19, %c0_20, %c0_21] : memref<1x16x32xbf16, #tpu.memory_space<vmem>>, vector<1x16x32xbf16>
    %43 = vector.shape_cast %42 : vector<1x16x32xbf16> to vector<16x32xbf16>
    %44 = vector.shape_cast %41 : vector<16x32xbf16> to vector<1x16x32xbf16>
    tpu.vector_store %arg8[%c0_19, %c0_20, %c0_21], %44 {strides = array<i32>} : memref<1x16x32xbf16, #tpu.memory_space<vmem>>, vector<1x16x32xbf16>,
    return
  }
  func.func @transform_0(%arg0: i32, %arg1: i32) -> (i32, i32, i32) {
    %c0_i32 = arith.constant 0 : i32
    %c0_i32_0 = arith.constant 0 : i32
    return %arg0, %arg1, %c0_i32 : i32, i32, i32
  }
  func.func @transform_1(%arg0: i32, %arg1: i32) -> (i32, i32) {
    %c0_i32 = arith.constant 0 : i32
    %c0_i32_0 = arith.constant 0 : i32
    %c0_i32_1 = arith.constant 0 : i32
    return %c0_i32, %c0_i32_0 : i32, i32
  }
  func.func @transform_2(%arg0: i32, %arg1: i32) -> (i32, i32) {
    %c0_i32 = arith.constant 0 : i32
    %c0_i32_0 = arith.constant 0 : i32
    %c0_i32_1 = arith.constant 0 : i32
    return %c0_i32, %c0_i32_0 : i32, i32
  }
  func.func @transform_3(%arg0: i32, %arg1: i32) -> (i32, i32) {
    %c0_i32 = arith.constant 0 : i32
    %c0_i32_0 = arith.constant 0 : i32
    %c0_i32_1 = arith.constant 0 : i32
    return %c0_i32, %c0_i32_0 : i32, i32
  }
  func.func @transform_4(%arg0: i32, %arg1: i32) -> (i32, i32, i32) {
    %c0_i32 = arith.constant 0 : i32
    %c0_i32_0 = arith.constant 0 : i32
    return %arg0, %arg1, %c0_i32 : i32, i32, i32
  }
  func.func @transform_5(%arg0: i32, %arg1: i32) -> (i32, i32, i32) {
    %c0_i32 = arith.constant 0 : i32
    %c0_i32_0 = arith.constant 0 : i32
    return %arg0, %arg1, %c0_i32 : i32, i32, i32
  }
  func.func @transform_6(%arg0: i32, %arg1: i32) -> (i32, i32, i32) {
    %c0_i32 = arith.constant 0 : i32
    %c0_i32_0 = arith.constant 0 : i32
    return %arg0, %arg1, %c0_i32 : i32, i32, i32
  }
}

</mosaic_0001>

<bundles_post_ra>
// kernel: tpu_custom_call.1
= control target key start
LH: loop header
LB: loop body
LE: loop exit
PB: predicated region body
PF: predicated region fallthrough
CT: control target
= control target key end

     0   :  { %s1378_s0 = inlined_call_operand.hbm [shape: bf16[2,16,32], index: 0, kind: input, shape index: {}]   ;;  %s1379_s1 = inlined_call_operand.vmem [shape: f32[1,32], index: 1, kind: input, shape index: {}]   ;;  %s1380_s2 = inlined_call_operand.vmem [shape: f32[1,32], index: 2, kind: input, shape index: {}]   ;;  %s1381_s3 = inlined_call_operand.hbm [shape: bf16[32,96], index: 3, kind: input, shape index: {}]   ;;  %s1382_s4 = inlined_call_operand.hbm [shape: bf16[2,16,32], index: 4, kind: output, shape index: {0}]   ;;  %s1383_s5 = inlined_call_operand.hbm [shape: bf16[2,16,32], index: 5, kind: output, shape index: {1}]   ;;  %s1384_s6 = inlined_call_operand.hbm [shape: bf16[2,16,32], index: 6, kind: output, shape index: {2}]  }
   0x1   :  { %1391 = sst [smem:[#allocation17_spill]] %s1381_s3 }
   0x2   :  { %12 = vsyncpa [#allocation3], 0 }
   0x3   :  { %14 = vsyncpa [#allocation3 + $0x1], 0 }
   0x4   :  { %15 = vsyncpa [#allocation6], 0 }
   0x5   :  { %16 = vsyncpa [#allocation4], 0 }
   0x6   :  { %18 = vsyncpa [#allocation4 + $0x1], 0 }
   0x7   :  { %19 = vsyncpa [#allocation9], 0 }
   0x8   :  { %21 = vsyncpa [#allocation9 + $0x1], 0  ;;  %s1086_s21 = smov 0   ;;  %s1088_s22 = smov 0  }
   0x9   :  { %s1090_s23 = smov 0   ;;  %s1092_s24 = smov 0  }
   0xa   :  { %s1094_s25 = smov 0   ;;  %s1096_s26 = smov 0  }
   0xb LB: > { %1392 = sst [smem:[#allocation15_spill]] %s1033_s25  ;;  %s1117_s27 = sadd.s32 4294967295, %s1037_s26   ;;  %s1037_s26 = sphi %s1096_s26, %s27_s26   ;;  %s1033_s25 = sphi %s1094_s25, %s1411_s25   ;;  %s1029_s24 = sphi %s1092_s24, %s1410_s24   ;;  %s1025_s23 = sphi %s1090_s23, %s1414_s23   ;;  %s1021_s22 = sphi %s1088_s22, %s1413_s22   ;;  %s1017_s21 = sphi %s1086_s21, %s1412_s21  }
   0xc   : > { %s1385_s28 = sadd.s32 4294967294, %s1037_s26   ;;  %p61_p0 = scmp.ne.s32.totalorder %s1021_s22, %s1017_s21 }
   0xd   : > { %p1390_p1 = scmp.eq.s32.totalorder %s1117_s27, 0  ;;  %p156_p3 = scmp.eq.s32.totalorder %s1385_s28, 1 }
   0xe   : > { %p696_p5 = scmp.ge.s32.totalorder %s1037_s26, 1  ;;  %p219_p7 = scmp.lt.s32.totalorder %s1037_s26, 3 }
   0xf   : > { %p1128_p4 = por %p1390_p1, %p61_p0  ;;  %p1133_p6 = por %p156_p3, %p61_p0 }
  0x10   : > { %p1138_p8 = pnand %p696_p5, %p219_p7  ;;  %s1039_s8 = smov [#allocation5]  }
  0x11   : > { %s1394_s30 = scalar_select %p1133_p6, 1, 0 }
  0x12   : > { %s237_s9 = sshll.u32 %s1039_s8, 4  ;;  %p759_p9 = pneg %p1138_p8  ;;  %s238_s9 = int_to_ptr.vmem [resolvable:$true] %s237_s9 }
  0x13   : > { %s39_s11 = sadd.s32 1, %s1033_s25  ;;  %s854_s12 = scalar_lea.vmem %s238_s9, 256 }
  0x14   : > { %p1147_p11 = pnand %p759_p9, %p1390_p1  ;;  %p855_p13 = scmp.ne.s32.totalorder %s238_s9, %s854_s12 }
  0x15   : > { %p862_p5 = scmp.lt.s32.totalorder %s238_s9, %s238_s9  ;;  %p863_p7 = scmp.lt.s32.totalorder %s854_s12, %s854_s12 }
  0x16   : > { %p845_p12 = pneg %p1147_p11 }
  0x17   : > { %p864_p2 = por %p863_p7, %p862_p5 }
  0x18   : > { %p857_p0 = pnand %p855_p13, %p845_p12 }
  0x1a   : > { %p858_p3 = pneg %p857_p0 }
  0x1c   : > { %p865_p6 = pnand %p864_p2, %p858_p3 }
  0x1e   : > { %868 = shalt.err (!%p865_p6)
}
  0x1f   : > { %s1386_s13 = smov 64   ;;  %s1387_s14 = smov 4  }
  0x20   : > { %s1397_s3 = sld [smem:[#allocation17_spill]]  ;;  %p41_p2 = scmp.ge.s32.totalorder %s39_s11, 2 }
  0x21   : > { %s48_s17 = sadd.s32 1, %s1025_s23  ;;  %p55_p6 = scmp.ne.s32.totalorder %s1025_s23, %s1021_s22 }
  0x22   : > { %p56_p9 = scmp.eq.s32.totalorder %s1037_s26, 0  ;;  %s1416_s11 = smov (%p41_p2, %s39_s11), 0 }
  0x23   : > { %1398 = sst [smem:[#allocation16_spill]] %s1416_s11  ;;  %p1400_p13 = scmp.eq.s32.totalorder %s1117_s27, 1 }
  0x24   : > { %p1168_p12 = por %p56_p9, %p55_p6  ;;  %s43_s20 = ssub.s32 %s1033_s25, %s1416_s11 }
  0x25   : > { %p1174_p0 = por %p1400_p13, %p55_p6  ;;  %p778_p3 = scmp.lt.s32.totalorder %s1037_s26, 2 }
  0x26   : > { %762 = dma.hbm_to_vmem [thread:$0]  (!%p1147_p11), %s1397_s3, 256, %s238_s9, [#allocation6], %s1386_s13, %s1386_s13, %s1387_s14  }
  0x27   : > { %p46_p11 = scmp.eq.s32.totalorder %s43_s20, 0  ;;  %s251_s8 = sand.u32 1, %s1025_s23  }
  0x28   : > { %s699_s9 = sshll.u32 %s251_s8, 3  ;;  %s726_s12 = sshll.u32 %s1033_s25, 7 }
  0x29   : > { %s1183_s10 = scalar_select %p46_p11, %s1025_s23, %s48_s17  }
  0x2a   : > { %s263_s28 = scalar_lea.hbm %s1378_s0, %s726_s12  ;;  %s255_s13 = scalar_lea.vmem [#allocation2], %s699_s9 }
  0x2b   : > { %s264_s14 = sshll.u32 %s255_s13, 4  ;;  %p1191_p5 = pnand %p778_p3, %p1168_p12  ;;  %s265_s14 = int_to_ptr.vmem [resolvable:$true] %s264_s14 }
  0x2c   : > { %s252_s11 = scalar_lea.sflag [#allocation3], %s251_s8  ;;  %s882_s20 = scalar_lea.vmem %s265_s14, 128 }
  0x2d   : > { %p871_p7 = pneg %p1191_p5  ;;  %p883_p2 = scmp.ne.s32.totalorder %s265_s14, %s882_s20 }
  0x2e   : > { %s1042_s17 = smov [#allocation2]  }
  0x2f   : > { %p885_p6 = pnand %p883_p2, %p871_p7  ;;  %s887_s25 = sshll.u32 %s1042_s17, 4  ;;  %s888_s25 = int_to_ptr.vmem [resolvable:$false] %s887_s25 }
  0x30   : > { %s889_s12 = scalar_lea.vmem %s888_s25, 256  ;;  %p890_p13 = scmp.lt.s32.totalorder %s265_s14, %s888_s25 }
  0x31   : > { %p886_p9 = pneg %p885_p6  ;;  %p891_p11 = scmp.lt.s32.totalorder %s889_s12, %s882_s20 }
  0x33   : > { %p892_p10 = por %p891_p11, %p890_p13 }
  0x35   : > { %p893_p1 = pnand %p892_p10, %p886_p9 }
  0x37   : > { %896 = shalt.err (!%p893_p1)
}
  0x38   : > { %s1403_s13 = smov 4   ;;  %s1404_s18 = smov 64  }
  0x39   : > { %766 = dma.hbm_to_vmem [thread:$0]  (!%p1191_p5), %s263_s28, 128, %s265_s14, %s252_s11, %s1404_s18, %s1404_s18, %s1403_s13  }
  0x3a   : > { %276 = sbr.rel (%p1138_p8) target bundleno = 733 (0x2dd), region = 36  ;;  %s1205_s8 = sand.u32 (!%p1138_p8), 1, %s1021_s22  }
  0x3b   : > { %s1208_s25 = sshll.u32 (!%p1138_p8), %s1205_s8, 3  ;;  %s279_s9 = scalar_lea.sflag (!%p1138_p8), [#allocation3], %s1205_s8 }
  0x3c   : > { %s282_s15 = scalar_lea.vmem (!%p1138_p8), [#allocation2], %s1208_s25 }
  0x3f   : > { %1000 = dma.done.wait (%p1128_p4), %s279_s9, 128  }
  0x40   : > { %1002 = vsyncadd (%p1128_p4), %s279_s9, 4294967168  ;;  %p1405_p1 = scmp.eq.s32.totalorder %s1117_s27, 0 }
  0x42   : > { %1004 = dma.done.wait (%p1405_p1), [#allocation6], 256   ;;  %p1406_p8 = pmov %p1405_p1 }
  0x43   : > { %v733_v0 = vld [vmem:[%s282_s15] sm:$0xff]   ;;  %vm336_vm0 = vcmask 261120   ;;  %v837_v15 = vld [vmem:[#allocation5 + $0x8] sm:$0xff]   ;;  %v1043_v16 = vmov 0.0   ;;  %vm1044_vm1 = vmmov 0   ;;  %v838_v17 = vld [vmem:[#allocation5] sm:$0xff]  }
  0x44   : > { %1006 = vsyncadd (%p1406_p8), [#allocation6], 4294967040  ;;  %v734_v1 = vunpack.c.l.bf16 %v733_v0  ;;  %v735_v2 = vunpack.c.h.bf16 %v733_v0  ;;  %739 = vmatprep.subr.bf16.mxu0 %v1043_v16  ;;  %743 = vmatprep.mubr.msk.bf16.mxu0 %vm1044_vm1, %v1043_v16  ;;  %v708_v26 = vld [vmem:[%s1379_s1] ss:$0 sm:$0xff]  ;;  %vm449_vm2 = vcmask 257024   ;;  %s310_s11 = scalar_lea.vmem [#allocation7], %s1208_s25 }
  0x45   : > { %740 = vmatpush3.bf16.msra.mxu0 %v837_v15  ;;  %v709_v30 = vld [vmem:[%s1380_s2] ss:$0 sm:$0xff]  ;;  %s494_s14 = sshll.u32 %s310_s11, 4  ;;  %s1233_s16 = sshll.u32 %s1029_s24, 7  ;;  %s1237_s14 = int_to_ptr.vmem [resolvable:$true] %s494_s14 }
  0x46   : > { %v337_v3 = vsel %vm336_vm0, %v734_v1, 0.0  ;;  %v340_v4 = vsel %vm336_vm0, %v735_v2, 0.0  ;;  %741 = vmatprep.subr.bf16.mxu0 %v1043_v16  ;;  %s1045_s20 = smov 64   ;;  %s1046_s17 = smov 96  }
  0x47   : > { %338 = vadd.xlane.f32.xlu0 %v337_v3  ;;  %s1243_s24 = scalar_lea.hbm %s1382_s4, %s1233_s16  ;;  %s469_s18 = scalar_lea.sflag [#allocation4], %s1205_s8 }
  0x48   : > { %s897_s9 = scalar_lea.vmem %s1237_s14, 128  ;;  %s1047_s15 = smov [#allocation7]  }
  0x49   : > { %742 = vmatpush3.bf16.msra.mxu0 %v838_v17  ;;  %p898_p4 = scmp.ne.s32.totalorder %s1237_s14, %s897_s9  ;;  %s901_s3 = sshll.u32 %s1047_s15, 4  ;;  %s902_s3 = int_to_ptr.vmem [resolvable:$false] %s901_s3 }
  0x4a   : > { %s903_s28 = scalar_lea.vmem %s902_s3, 256  ;;  %p904_p3 = scmp.lt.s32.totalorder %s1237_s14, %s902_s3 }
  0x4b   : > { %341 = vadd.xlane.f32.xlu0 %v340_v4  ;;  %p899_p10 = pnand %p898_p4, %p1174_p0  ;;  %p905_p5 = scmp.lt.s32.totalorder %s903_s28, %s897_s9 }
  0x4d   : > { %p900_p12 = pneg %p899_p10  ;;  %p906_p7 = por %p905_p5, %p904_p3 }
  0x4f   : > { %p907_p2 = pnand %p906_p7, %p900_p12 }
  0xd0   : > { %v339_v5 = vpop.xlane.xlu0 %338 }
  0xd1   : > { %v344_v6 = vmul.f32 0.03125, %v339_v5 }
  0xd3   : > { %v346_v7 = vsub.f32 %v734_v1, %v344_v6 }
  0xd4   : > { %v342_v8 = vpop.xlane.xlu0 %341 }
  0xd5   : > { %v345_v9 = vmul.f32 0.03125, %v342_v8  ;;  %v348_v10 = vmul.f32 %v346_v7, %v346_v7 }
  0xd7   : > { %v347_v11 = vsub.f32 %v735_v2, %v345_v9  ;;  %v350_v12 = vsel %vm336_vm0, %v348_v10, 0.0 }
  0xd8   : > { %351 = vadd.xlane.f32.xlu1 %v350_v12 }
  0xd9   : > { %v349_v13 = vmul.f32 %v347_v11, %v347_v11 }
  0xdb   : > { %v353_v14 = vsel %vm336_vm0, %v349_v13, 0.0 }
  0xdc   : > { %354 = vadd.xlane.f32.xlu1 %v353_v14 }
 0x161   : > { %v352_v18 = vpop.xlane.xlu1 %351 }
 0x162   : > { %v356_v19 = vmul.f32 0.03125, %v352_v18 }
 0x164   : > { %v358_v20 = vadd.f32 1e-05, %v356_v19 }
 0x165   : > { %v355_v21 = vpop.xlane.xlu1 %354 }
 0x166   : > { %839 = vrsqrt.f32 %v358_v20  ;;  %v357_v22 = vmul.f32 0.03125, %v355_v21 }
 0x168   : > { %v359_v23 = vadd.f32 1e-05, %v357_v22 }
 0x16a   : > { %841 = vrsqrt.f32 %v359_v23 }
 0x173   : > { %v840_v24 = vpop.eup %839 }
 0x174   : > { %v362_v25 = vmul.f32 %v840_v24, %v346_v7 }
 0x176   : > { %v370_v29 = vmul.f32 %v708_v26, %v362_v25 }
 0x177   : > { %v842_v27 = vpop.eup %841 }
 0x178   : > { %v363_v28 = vmul.f32 %v842_v27, %v347_v11  ;;  %v378_v32 = vadd.f32 %v709_v30, %v370_v29 }
 0x17a   : > { %v371_v31 = vmul.f32 %v708_v26, %v363_v28 }
 0x17c   : > { %v379_v33 = vadd.f32 %v709_v30, %v371_v31 }
 0x17e   : > { %v380_v34 = vpack.c.bf16 %v379_v33, %v378_v32 }
 0x180   : > { %744 = vmatmul.mubr.msk.bf16.vlgmr.msra.gmra.mxu0 %vm336_vm0, %v380_v34 }
 0x240   : > { %v434_v35 = vpop.f32.mrf.mxu0 }
 0x241   : > { %v727_v36 = vpack.c.bf16 %v434_v35, %v434_v35 }
 0x242   : > { %v745_v37 = vpop.f32.mrf.mxu0 }
 0x243   : > { %450 = vst.msk [vmem:[%s310_s11] sm:$0xf] %vm449_vm2, %v727_v36  ;;  %460 = vrot.lane.b32.xlu1 %v727_v36, %s1045_s20  ;;  %452 = vrot.lane.b32.xlu0 %v727_v36, %s1046_s17 }
 0x244   : > { %v437_v38 = vpop.f32.mrf.mxu0 }
 0x245   : > { %v728_v39 = vpack.c.bf16 %v437_v38, %v437_v38 }
 0x246   : > { %v746_v40 = vpop.f32.mrf.mxu0 }
 0x247   : > { %451 = vst.msk [vmem:[%s310_s11 + $0x4] sm:$0xf] %vm449_vm2, %v728_v39  ;;  %454 = vrot.lane.b32.xlu1 %v728_v39, %s1046_s17 }
 0x248   : > { %910 = shalt.err (!%p907_p2)
}
 0x249   : > { %s911_s29 = scalar_lea.hbm %s1243_s24, 128  ;;  %s915_s17 = scalar_lea.hbm %s1382_s4, 256 }
 0x24a   : > { %p912_p6 = scmp.ne.s32.totalorder %s1243_s24, %s911_s29  ;;  %p916_p11 = scmp.lt.s32.totalorder %s1243_s24, %s1382_s4 }
 0x24b   : > { %p917_p1 = scmp.lt.s32.totalorder %s915_s17, %s911_s29 }
 0x24c   : > { %p913_p9 = pnand %p912_p6, %p1174_p0 }
 0x24d   : > { %p918_p8 = por %p917_p1, %p916_p11 }
 0x24e   : > { %p914_p13 = pneg %p913_p9 }
 0x250   : > { %p919_p4 = pnand %p918_p8, %p914_p13 }
 0x252   : > { %922 = shalt.err (!%p919_p4)
}
 0x253   : > { %s1048_s9 = smov 4   ;;  %462 = vrot.lane.b32.xlu1 %v728_v39, %s1045_s20  ;;  %s317_s15 = scalar_lea.vmem [#allocation8], %s1208_s25 }
 0x254   : > { %753 = dma.vmem_to_hbm [thread:$0]  (%p1174_p0), %s1237_s14, 128, %s1243_s24, %s469_s18, %s1045_s20, %s1045_s20, %s1048_s9  }
 0x255   : > { %s512_s3 = sshll.u32 %s317_s15, 4  ;;  %s473_s28 = sand.u32 1, %s1117_s27   ;;  %s1281_s3 = int_to_ptr.vmem [resolvable:$true] %s512_s3 }
 0x256   : > { %s1276_s29 = scalar_lea.vmem [#allocation10], %s1208_s25  ;;  %s1287_s24 = scalar_lea.hbm %s1383_s5, %s1233_s16 }
 0x257   : > { %s530_s18 = sshll.u32 %s1276_s29, 4  ;;  %s1291_s27 = scalar_lea.sflag [#allocation9], %s473_s28  ;;  %s1319_s18 = int_to_ptr.vmem [resolvable:$true] %s530_s18 }
 0x258   : > { %s923_s25 = scalar_lea.vmem %s1281_s3, 128  ;;  %s1049_s7 = smov [#allocation8]  }
 0x259   : > { %p924_p10 = scmp.ne.s32.totalorder %s1281_s3, %s923_s25  ;;  %s927_s11 = sshll.u32 %s1049_s7, 4  ;;  %s928_s11 = int_to_ptr.vmem [resolvable:$false] %s927_s11 }
 0x25a   : > { %s929_s17 = scalar_lea.vmem %s928_s11, 256  ;;  %p930_p5 = scmp.lt.s32.totalorder %s1281_s3, %s928_s11 }
 0x25b   : > { %p925_p12 = pnand %p924_p10, %p1174_p0  ;;  %p931_p7 = scmp.lt.s32.totalorder %s929_s17, %s923_s25 }
 0x25d   : > { %p926_p3 = pneg %p925_p12  ;;  %p932_p2 = por %p931_p7, %p930_p5 }
 0x25f   : > { %p933_p6 = pnand %p932_p2, %p926_p3 }
 0x2b5   : > { %v461_v41 = vpop.permute.xlu1 %460  ;;  %v453_v42 = vpop.permute.xlu0 %452 }
 0x2b6   : > { %466 = vst.msk [vmem:[%s1276_s29] sm:$0xf] %vm449_vm2, %v461_v41  ;;  %458 = vst.msk [vmem:[%s317_s15] sm:$0xf] %vm449_vm2, %v453_v42 }
 0x2b9   : > { %v455_v43 = vpop.permute.xlu1 %454 }
 0x2ba   : > { %459 = vst.msk [vmem:[%s317_s15 + $0x4] sm:$0xf] %vm449_vm2, %v455_v43 }
 0x2bb   : > { %936 = shalt.err (!%p933_p6)
}
 0x2bc   : > { %s937_s12 = scalar_lea.hbm %s1287_s24, 128  ;;  %s941_s28 = scalar_lea.hbm %s1383_s5, 256 }
 0x2bd   : > { %p938_p9 = scmp.ne.s32.totalorder %s1287_s24, %s937_s12  ;;  %p942_p1 = scmp.lt.s32.totalorder %s1287_s24, %s1383_s5 }
 0x2be   : > { %p943_p8 = scmp.lt.s32.totalorder %s941_s28, %s937_s12 }
 0x2bf   : > { %p939_p13 = pnand %p938_p9, %p1174_p0 }
 0x2c0   : > { %p944_p4 = por %p943_p8, %p942_p1 }
 0x2c1   : > { %p940_p11 = pneg %p939_p13 }
 0x2c3   : > { %p945_p10 = pnand %p944_p4, %p940_p11 }
 0x2c5   : > { %948 = shalt.err (!%p945_p10)
}
 0x2c6   : > { %754 = dma.vmem_to_hbm [thread:$0]  (%p1174_p0), %s1281_s3, 128, %s1287_s24, %s1291_s27, %s1045_s20, %s1045_s20, %s1048_s9   ;;  %v463_v44 = vpop.permute.xlu1 %462 }
 0x2c7   : > { %s1325_s11 = scalar_lea.hbm %s1384_s6, %s1233_s16  ;;  %467 = vst.msk [vmem:[%s1276_s29 + $0x4] sm:$0xf] %vm449_vm2, %v463_v44  ;;  %s949_s17 = scalar_lea.vmem %s1319_s18, 128 }
 0x2c8   : > { %p950_p12 = scmp.ne.s32.totalorder %s1319_s18, %s949_s17  ;;  %s1050_s3 = smov [#allocation10]  }
 0x2c9   : > { %s953_s24 = sshll.u32 %s1050_s3, 4  ;;  %s954_s24 = int_to_ptr.vmem [resolvable:$false] %s953_s24 }
 0x2ca   : > { %p951_p3 = pnand %p950_p12, %p1174_p0  ;;  %s955_s12 = scalar_lea.vmem %s954_s24, 256 }
 0x2cb   : > { %p956_p7 = scmp.lt.s32.totalorder %s1319_s18, %s954_s24  ;;  %p957_p2 = scmp.lt.s32.totalorder %s955_s12, %s949_s17 }
 0x2cc   : > { %p952_p5 = pneg %p951_p3 }
 0x2cd   : > { %p958_p6 = por %p957_p2, %p956_p7 }
 0x2cf   : > { %p959_p9 = pnand %p958_p6, %p952_p5 }
 0x2d1   : > { %962 = shalt.err (!%p959_p9)
}
 0x2d2   : > { %s963_s16 = scalar_lea.hbm %s1325_s11, 128  ;;  %s967_s15 = scalar_lea.hbm %s1384_s6, 256 }
 0x2d3   : > { %p964_p13 = scmp.ne.s32.totalorder %s1325_s11, %s963_s16  ;;  %p968_p8 = scmp.lt.s32.totalorder %s1325_s11, %s1384_s6 }
 0x2d4   : > { %p969_p4 = scmp.lt.s32.totalorder %s967_s15, %s963_s16 }
 0x2d5   : > { %p965_p11 = pnand %p964_p13, %p1174_p0 }
 0x2d6   : > { %p970_p10 = por %p969_p4, %p968_p8 }
 0x2d7   : > { %p966_p1 = pneg %p965_p11 }
 0x2d9   : > { %p971_p12 = pnand %p970_p10, %p966_p1 }
 0x2db   : > { %974 = shalt.err (!%p971_p12)
}
 0x2dc   : > { %755 = dma.vmem_to_hbm [thread:$0]  (%p1174_p0), %s1319_s18, 128, %s1325_s11, %s1291_s27, %s1045_s20, %s1045_s20, %s1048_s9  }
 0x2dd PF: > { %s545_s14 = sand.u32 1, %s1017_s21   ;;  %p1407_p3 = scmp.ne.s32.totalorder %s1394_s30, 0 }
 0x2de   : > { %p1408_p5 = scmp.ge.s32.totalorder %s1037_s26, 2  ;;  %s546_s25 = scalar_lea.sflag [#allocation4], %s545_s14 }
 0x2e0   : > { %p768_p7 = pnand %p1408_p5, %p1407_p3 }
 0x2e2   : > { %p769_p2 = pneg %p768_p7 }
 0x2e4   : > { %1008 = dma.done.wait (%p769_p2), %s546_s25, 128  }
 0x2e5   : > { %1010 = vsyncadd (%p769_p2), %s546_s25, 4294967168  ;;  %s1409_s19 = sadd.s32 4294967294, %s1037_s26  }
 0x2e6   : > { %s554_s7 = sand.u32 1, %s1409_s19  }
 0x2e7   : > { %s555_s17 = scalar_lea.sflag [#allocation9], %s554_s7 }
 0x2e8   : > { %1012 = dma.done.wait (%p769_p2), %s555_s17, 256  }
 0x2e9   : > { %1014 = vsyncadd (%p769_p2), %s555_s17, 4294967040  ;;  %s27_s26 = sadd.s32 1, %s1037_s26   ;;  %s1410_s24 = sld [smem:[#allocation15_spill]] }
 0x2ea   : > { %p24_p0 = scmp.ge.s32.totalorder %s27_s26, 4   ;;  %s1411_s25 = sld [smem:[#allocation16_spill]] }
 0x2eb   : > { %s1412_s21 = smov %s1021_s22  ;;  %s1413_s22 = smov %s1025_s23 }
 0x2ec   : > { %s1414_s23 = smov %s1183_s10  ;;  %26 = sbr.rel (!%p24_p0) target bundleno = 11 (0xb), region = 117 }
 0x2f1   :  { %569 = vsyncpa [#allocation3], 1 }
 0x2f2   :  { %571 = vsyncpa [#allocation3 + $0x1], 1 }
 0x2f3   :  { %572 = vsyncpa [#allocation6], 1 }
 0x2f4   :  { %573 = vsyncpa [#allocation4], 1 }
 0x2f5   :  { %575 = vsyncpa [#allocation4 + $0x1], 1 }
 0x2f6   :  { %576 = vsyncpa [#allocation9], 1 }
 0x2f7   :  { %578 = vsyncpa [#allocation9 + $0x1], 1 }

// kernel: tpu_custom_call.1
= control target key start
LH: loop header
LB: loop body
LE: loop exit
PB: predicated region body
PF: predicated region fallthrough
CT: control target
= control target key end

     0   :  { %s1378_s0 = inlined_call_operand.hbm [shape: bf16[2,16,32], index: 0, kind: input, shape index: {}]   ;;  %s1379_s1 = inlined_call_operand.vmem [shape: f32[1,32], index: 1, kind: input, shape index: {}]   ;;  %s1380_s2 = inlined_call_operand.vmem [shape: f32[1,32], index: 2, kind: input, shape index: {}]   ;;  %s1381_s3 = inlined_call_operand.hbm [shape: bf16[32,96], index: 3, kind: input, shape index: {}]   ;;  %s1382_s4 = inlined_call_operand.hbm [shape: bf16[2,16,32], index: 4, kind: output, shape index: {0}]   ;;  %s1383_s5 = inlined_call_operand.hbm [shape: bf16[2,16,32], index: 5, kind: output, shape index: {1}]   ;;  %s1384_s6 = inlined_call_operand.hbm [shape: bf16[2,16,32], index: 6, kind: output, shape index: {2}]  }
   0x1   :  { %1391 = sst [smem:[#allocation17_spill]] %s1381_s3 }
   0x2   :  { %12 = vsyncpa [#allocation3], 0 }
   0x3   :  { %14 = vsyncpa [#allocation3 + $0x1], 0 }
   0x4   :  { %15 = vsyncpa [#allocation6], 0 }
   0x5   :  { %16 = vsyncpa [#allocation4], 0 }
   0x6   :  { %18 = vsyncpa [#allocation4 + $0x1], 0 }
   0x7   :  { %19 = vsyncpa [#allocation9], 0 }
   0x8   :  { %21 = vsyncpa [#allocation9 + $0x1], 0  ;;  %s1086_s21 = smov 0   ;;  %s1088_s22 = smov 0  }
   0x9   :  { %s1090_s23 = smov 0   ;;  %s1092_s24 = smov 0  }
   0xa   :  { %s1094_s25 = smov 0   ;;  %s1096_s26 = smov 0  }
   0xb LB: > { %1392 = sst [smem:[#allocation15_spill]] %s1033_s25  ;;  %s1117_s27 = sadd.s32 4294967295, %s1037_s26   ;;  %s1037_s26 = sphi %s1096_s26, %s27_s26   ;;  %s1033_s25 = sphi %s1094_s25, %s1411_s25   ;;  %s1029_s24 = sphi %s1092_s24, %s1410_s24   ;;  %s1025_s23 = sphi %s1090_s23, %s1414_s23   ;;  %s1021_s22 = sphi %s1088_s22, %s1413_s22   ;;  %s1017_s21 = sphi %s1086_s21, %s1412_s21  }
   0xc   : > { %s1385_s28 = sadd.s32 4294967294, %s1037_s26   ;;  %p61_p0 = scmp.ne.s32.totalorder %s1021_s22, %s1017_s21 }
   0xd   : > { %p1390_p1 = scmp.eq.s32.totalorder %s1117_s27, 0  ;;  %p156_p3 = scmp.eq.s32.totalorder %s1385_s28, 1 }
   0xe   : > { %p696_p5 = scmp.ge.s32.totalorder %s1037_s26, 1  ;;  %p219_p7 = scmp.lt.s32.totalorder %s1037_s26, 3 }
   0xf   : > { %p1128_p4 = por %p1390_p1, %p61_p0  ;;  %p1133_p6 = por %p156_p3, %p61_p0 }
  0x10   : > { %p1138_p8 = pnand %p696_p5, %p219_p7  ;;  %s1039_s8 = smov [#allocation5]  }
  0x11   : > { %s1394_s30 = scalar_select %p1133_p6, 1, 0 }
  0x12   : > { %s237_s9 = sshll.u32 %s1039_s8, 4  ;;  %p759_p9 = pneg %p1138_p8  ;;  %s238_s9 = int_to_ptr.vmem [resolvable:$true] %s237_s9 }
  0x13   : > { %s39_s11 = sadd.s32 1, %s1033_s25  ;;  %s854_s12 = scalar_lea.vmem %s238_s9, 256 }
  0x14   : > { %p1147_p11 = pnand %p759_p9, %p1390_p1  ;;  %p855_p13 = scmp.ne.s32.totalorder %s238_s9, %s854_s12 }
  0x15   : > { %p862_p5 = scmp.lt.s32.totalorder %s238_s9, %s238_s9  ;;  %p863_p7 = scmp.lt.s32.totalorder %s854_s12, %s854_s12 }
  0x16   : > { %p845_p12 = pneg %p1147_p11 }
  0x17   : > { %p864_p2 = por %p863_p7, %p862_p5 }
  0x18   : > { %p857_p0 = pnand %p855_p13, %p845_p12 }
  0x1a   : > { %p858_p3 = pneg %p857_p0 }
  0x1c   : > { %p865_p6 = pnand %p864_p2, %p858_p3 }
  0x1e   : > { %868 = shalt.err (!%p865_p6)
}
  0x1f   : > { %s1386_s13 = smov 64   ;;  %s1387_s14 = smov 4  }
  0x20   : > { %s1397_s3 = sld [smem:[#allocation17_spill]]  ;;  %p41_p2 = scmp.ge.s32.totalorder %s39_s11, 2 }
  0x21   : > { %s48_s17 = sadd.s32 1, %s1025_s23  ;;  %p55_p6 = scmp.ne.s32.totalorder %s1025_s23, %s1021_s22 }
  0x22   : > { %p56_p9 = scmp.eq.s32.totalorder %s1037_s26, 0  ;;  %s1416_s11 = smov (%p41_p2, %s39_s11), 0 }
  0x23   : > { %1398 = sst [smem:[#allocation16_spill]] %s1416_s11  ;;  %p1400_p13 = scmp.eq.s32.totalorder %s1117_s27, 1 }
  0x24   : > { %p1168_p12 = por %p56_p9, %p55_p6  ;;  %s43_s20 = ssub.s32 %s1033_s25, %s1416_s11 }
  0x25   : > { %p1174_p0 = por %p1400_p13, %p55_p6  ;;  %p778_p3 = scmp.lt.s32.totalorder %s1037_s26, 2 }
  0x26   : > { %762 = dma.hbm_to_vmem [thread:$0]  (!%p1147_p11), %s1397_s3, 256, %s238_s9, [#allocation6], %s1386_s13, %s1386_s13, %s1387_s14  }
  0x27   : > { %p46_p11 = scmp.eq.s32.totalorder %s43_s20, 0  ;;  %s251_s8 = sand.u32 1, %s1025_s23  }
  0x28   : > { %s699_s9 = sshll.u32 %s251_s8, 3  ;;  %s726_s12 = sshll.u32 %s1033_s25, 7 }
  0x29   : > { %s1183_s10 = scalar_select %p46_p11, %s1025_s23, %s48_s17  }
  0x2a   : > { %s263_s28 = scalar_lea.hbm %s1378_s0, %s726_s12  ;;  %s255_s13 = scalar_lea.vmem [#allocation2], %s699_s9 }
  0x2b   : > { %s264_s14 = sshll.u32 %s255_s13, 4  ;;  %p1191_p5 = pnand %p778_p3, %p1168_p12  ;;  %s265_s14 = int_to_ptr.vmem [resolvable:$true] %s264_s14 }
  0x2c   : > { %s252_s11 = scalar_lea.sflag [#allocation3], %s251_s8  ;;  %s882_s20 = scalar_lea.vmem %s265_s14, 128 }
  0x2d   : > { %p871_p7 = pneg %p1191_p5  ;;  %p883_p2 = scmp.ne.s32.totalorder %s265_s14, %s882_s20 }
  0x2e   : > { %s1042_s17 = smov [#allocation2]  }
  0x2f   : > { %p885_p6 = pnand %p883_p2, %p871_p7  ;;  %s887_s25 = sshll.u32 %s1042_s17, 4  ;;  %s888_s25 = int_to_ptr.vmem [resolvable:$false] %s887_s25 }
  0x30   : > { %s889_s12 = scalar_lea.vmem %s888_s25, 256  ;;  %p890_p13 = scmp.lt.s32.totalorder %s265_s14, %s888_s25 }
  0x31   : > { %p886_p9 = pneg %p885_p6  ;;  %p891_p11 = scmp.lt.s32.totalorder %s889_s12, %s882_s20 }
  0x33   : > { %p892_p10 = por %p891_p11, %p890_p13 }
  0x35   : > { %p893_p1 = pnand %p892_p10, %p886_p9 }
  0x37   : > { %896 = shalt.err (!%p893_p1)
}
  0x38   : > { %s1403_s13 = smov 4   ;;  %s1404_s18 = smov 64  }
  0x39   : > { %766 = dma.hbm_to_vmem [thread:$0]  (!%p1191_p5), %s263_s28, 128, %s265_s14, %s252_s11, %s1404_s18, %s1404_s18, %s1403_s13  }
  0x3a   : > { %276 = sbr.rel (%p1138_p8) target bundleno = 733 (0x2dd), region = 36  ;;  %s1205_s8 = sand.u32 (!%p1138_p8), 1, %s1021_s22  }
  0x3b   : > { %s1208_s25 = sshll.u32 (!%p1138_p8), %s1205_s8, 3  ;;  %s279_s9 = scalar_lea.sflag (!%p1138_p8), [#allocation3], %s1205_s8 }
  0x3c   : > { %s282_s15 = scalar_lea.vmem (!%p1138_p8), [#allocation2], %s1208_s25 }
  0x3f   : > { %1000 = dma.done.wait (%p1128_p4), %s279_s9, 128  }
  0x40   : > { %1002 = vsyncadd (%p1128_p4), %s279_s9, 4294967168  ;;  %p1405_p1 = scmp.eq.s32.totalorder %s1117_s27, 0 }
  0x42   : > { %1004 = dma.done.wait (%p1405_p1), [#allocation6], 256   ;;  %p1406_p8 = pmov %p1405_p1 }
  0x43   : > { %v733_v0 = vld [vmem:[%s282_s15] sm:$0xff]   ;;  %vm336_vm0 = vcmask 261120   ;;  %v837_v15 = vld [vmem:[#allocation5 + $0x8] sm:$0xff]   ;;  %v1043_v16 = vmov 0.0   ;;  %vm1044_vm1 = vmmov 0   ;;  %v838_v17 = vld [vmem:[#allocation5] sm:$0xff]  }
  0x44   : > { %1006 = vsyncadd (%p1406_p8), [#allocation6], 4294967040  ;;  %v734_v1 = vunpack.c.l.bf16 %v733_v0  ;;  %v735_v2 = vunpack.c.h.bf16 %v733_v0  ;;  %739 = vmatprep.subr.bf16.mxu0 %v1043_v16  ;;  %743 = vmatprep.mubr.msk.bf16.mxu0 %vm1044_vm1, %v1043_v16  ;;  %v708_v26 = vld [vmem:[%s1379_s1] ss:$0 sm:$0xff]  ;;  %vm449_vm2 = vcmask 257024   ;;  %s310_s11 = scalar_lea.vmem [#allocation7], %s1208_s25 }
  0x45   : > { %740 = vmatpush3.bf16.msra.mxu0 %v837_v15  ;;  %v709_v30 = vld [vmem:[%s1380_s2] ss:$0 sm:$0xff]  ;;  %s494_s14 = sshll.u32 %s310_s11, 4  ;;  %s1233_s16 = sshll.u32 %s1029_s24, 7  ;;  %s1237_s14 = int_to_ptr.vmem [resolvable:$true] %s494_s14 }
  0x46   : > { %v337_v3 = vsel %vm336_vm0, %v734_v1, 0.0  ;;  %v340_v4 = vsel %vm336_vm0, %v735_v2, 0.0  ;;  %741 = vmatprep.subr.bf16.mxu0 %v1043_v16  ;;  %s1045_s20 = smov 64   ;;  %s1046_s17 = smov 96  }
  0x47   : > { %338 = vadd.xlane.f32.xlu0 %v337_v3  ;;  %s1243_s24 = scalar_lea.hbm %s1382_s4, %s1233_s16  ;;  %s469_s18 = scalar_lea.sflag [#allocation4], %s1205_s8 }
  0x48   : > { %s897_s9 = scalar_lea.vmem %s1237_s14, 128  ;;  %s1047_s15 = smov [#allocation7]  }
  0x49   : > { %742 = vmatpush3.bf16.msra.mxu0 %v838_v17  ;;  %p898_p4 = scmp.ne.s32.totalorder %s1237_s14, %s897_s9  ;;  %s901_s3 = sshll.u32 %s1047_s15, 4  ;;  %s902_s3 = int_to_ptr.vmem [resolvable:$false] %s901_s3 }
  0x4a   : > { %s903_s28 = scalar_lea.vmem %s902_s3, 256  ;;  %p904_p3 = scmp.lt.s32.totalorder %s1237_s14, %s902_s3 }
  0x4b   : > { %341 = vadd.xlane.f32.xlu0 %v340_v4  ;;  %p899_p10 = pnand %p898_p4, %p1174_p0  ;;  %p905_p5 = scmp.lt.s32.totalorder %s903_s28, %s897_s9 }
  0x4d   : > { %p900_p12 = pneg %p899_p10  ;;  %p906_p7 = por %p905_p5, %p904_p3 }
  0x4f   : > { %p907_p2 = pnand %p906_p7, %p900_p12 }
  0xd0   : > { %v339_v5 = vpop.xlane.xlu0 %338 }
  0xd1   : > { %v344_v6 = vmul.f32 0.03125, %v339_v5 }
  0xd3   : > { %v346_v7 = vsub.f32 %v734_v1, %v344_v6 }
  0xd4   : > { %v342_v8 = vpop.xlane.xlu0 %341 }
  0xd5   : > { %v345_v9 = vmul.f32 0.03125, %v342_v8  ;;  %v348_v10 = vmul.f32 %v346_v7, %v346_v7 }
  0xd7   : > { %v347_v11 = vsub.f32 %v735_v2, %v345_v9  ;;  %v350_v12 = vsel %vm336_vm0, %v348_v10, 0.0 }
  0xd8   : > { %351 = vadd.xlane.f32.xlu1 %v350_v12 }
  0xd9   : > { %v349_v13 = vmul.f32 %v347_v11, %v347_v11 }
  0xdb   : > { %v353_v14 = vsel %vm336_vm0, %v349_v13, 0.0 }
  0xdc   : > { %354 = vadd.xlane.f32.xlu1 %v353_v14 }
 0x161   : > { %v352_v18 = vpop.xlane.xlu1 %351 }
 0x162   : > { %v356_v19 = vmul.f32 0.03125, %v352_v18 }
 0x164   : > { %v358_v20 = vadd.f32 1e-05, %v356_v19 }
 0x165   : > { %v355_v21 = vpop.xlane.xlu1 %354 }
 0x166   : > { %839 = vrsqrt.f32 %v358_v20  ;;  %v357_v22 = vmul.f32 0.03125, %v355_v21 }
 0x168   : > { %v359_v23 = vadd.f32 1e-05, %v357_v22 }
 0x16a   : > { %841 = vrsqrt.f32 %v359_v23 }
 0x173   : > { %v840_v24 = vpop.eup %839 }
 0x174   : > { %v362_v25 = vmul.f32 %v840_v24, %v346_v7 }
 0x176   : > { %v370_v29 = vmul.f32 %v708_v26, %v362_v25 }
 0x177   : > { %v842_v27 = vpop.eup %841 }
 0x178   : > { %v363_v28 = vmul.f32 %v842_v27, %v347_v11  ;;  %v378_v32 = vadd.f32 %v709_v30, %v370_v29 }
 0x17a   : > { %v371_v31 = vmul.f32 %v708_v26, %v363_v28 }
 0x17c   : > { %v379_v33 = vadd.f32 %v709_v30, %v371_v31 }
 0x17e   : > { %v380_v34 = vpack.c.bf16 %v379_v33, %v378_v32 }
 0x180   : > { %744 = vmatmul.mubr.msk.bf16.vlgmr.msra.gmra.mxu0 %vm336_vm0, %v380_v34 }
 0x240   : > { %v434_v35 = vpop.f32.mrf.mxu0 }
 0x241   : > { %v727_v36 = vpack.c.bf16 %v434_v35, %v434_v35 }
 0x242   : > { %v745_v37 = vpop.f32.mrf.mxu0 }
 0x243   : > { %450 = vst.msk [vmem:[%s310_s11] sm:$0xf] %vm449_vm2, %v727_v36  ;;  %460 = vrot.lane.b32.xlu1 %v727_v36, %s1045_s20  ;;  %452 = vrot.lane.b32.xlu0 %v727_v36, %s1046_s17 }
 0x244   : > { %v437_v38 = vpop.f32.mrf.mxu0 }
 0x245   : > { %v728_v39 = vpack.c.bf16 %v437_v38, %v437_v38 }
 0x246   : > { %v746_v40 = vpop.f32.mrf.mxu0 }
 0x247   : > { %451 = vst.msk [vmem:[%s310_s11 + $0x4] sm:$0xf] %vm449_vm2, %v728_v39  ;;  %454 = vrot.lane.b32.xlu1 %v728_v39, %s1046_s17 }
 0x248   : > { %910 = shalt.err (!%p907_p2)
}
 0x249   : > { %s911_s29 = scalar_lea.hbm %s1243_s24, 128  ;;  %s915_s17 = scalar_lea.hbm %s1382_s4, 256 }
 0x24a   : > { %p912_p6 = scmp.ne.s32.totalorder %s1243_s24, %s911_s29  ;;  %p916_p11 = scmp.lt.s32.totalorder %s1243_s24, %s1382_s4 }
 0x24b   : > { %p917_p1 = scmp.lt.s32.totalorder %s915_s17, %s911_s29 }
 0x24c   : > { %p913_p9 = pnand %p912_p6, %p1174_p0 }
 0x24d   : > { %p918_p8 = por %p917_p1, %p916_p11 }
 0x24e   : > { %p914_p13 = pneg %p913_p9 }
 0x250   : > { %p919_p4 = pnand %p918_p8, %p914_p13 }
 0x252   : > { %922 = shalt.err (!%p919_p4)
}
 0x253   : > { %s1048_s9 = smov 4   ;;  %462 = vrot.lane.b32.xlu1 %v728_v39, %s1045_s20  ;;  %s317_s15 = scalar_lea.vmem [#allocation8], %s1208_s25 }
 0x254   : > { %753 = dma.vmem_to_hbm [thread:$0]  (%p1174_p0), %s1237_s14, 128, %s1243_s24, %s469_s18, %s1045_s20, %s1045_s20, %s1048_s9  }
 0x255   : > { %s512_s3 = sshll.u32 %s317_s15, 4  ;;  %s473_s28 = sand.u32 1, %s1117_s27   ;;  %s1281_s3 = int_to_ptr.vmem [resolvable:$true] %s512_s3 }
 0x256   : > { %s1276_s29 = scalar_lea.vmem [#allocation10], %s1208_s25  ;;  %s1287_s24 = scalar_lea.hbm %s1383_s5, %s1233_s16 }
 0x257   : > { %s530_s18 = sshll.u32 %s1276_s29, 4  ;;  %s1291_s27 = scalar_lea.sflag [#allocation9], %s473_s28  ;;  %s1319_s18 = int_to_ptr.vmem [resolvable:$true] %s530_s18 }
 0x258   : > { %s923_s25 = scalar_lea.vmem %s1281_s3, 128  ;;  %s1049_s7 = smov [#allocation8]  }
 0x259   : > { %p924_p10 = scmp.ne.s32.totalorder %s1281_s3, %s923_s25  ;;  %s927_s11 = sshll.u32 %s1049_s7, 4  ;;  %s928_s11 = int_to_ptr.vmem [resolvable:$false] %s927_s11 }
 0x25a   : > { %s929_s17 = scalar_lea.vmem %s928_s11, 256  ;;  %p930_p5 = scmp.lt.s32.totalorder %s1281_s3, %s928_s11 }
 0x25b   : > { %p925_p12 = pnand %p924_p10, %p1174_p0  ;;  %p931_p7 = scmp.lt.s32.totalorder %s929_s17, %s923_s25 }
 0x25d   : > { %p926_p3 = pneg %p925_p12  ;;  %p932_p2 = por %p931_p7, %p930_p5 }
 0x25f   : > { %p933_p6 = pnand %p932_p2, %p926_p3 }
 0x2b5   : > { %v461_v41 = vpop.permute.xlu1 %460  ;;  %v453_v42 = vpop.permute.xlu0 %452 }
 0x2b6   : > { %466 = vst.msk [vmem:[%s1276_s29] sm:$0xf] %vm449_vm2, %v461_v41  ;;  %458 = vst.msk [vmem:[%s317_s15] sm:$0xf] %vm449_vm2, %v453_v42 }
 0x2b9   : > { %v455_v43 = vpop.permute.xlu1 %454 }
 0x2ba   : > { %459 = vst.msk [vmem:[%s317_s15 + $0x4] sm:$0xf] %vm449_vm2, %v455_v43 }
 0x2bb   : > { %936 = shalt.err (!%p933_p6)
}
 0x2bc   : > { %s937_s12 = scalar_lea.hbm %s1287_s24, 128  ;;  %s941_s28 = scalar_lea.hbm %s1383_s5, 256 }
 0x2bd   : > { %p938_p9 = scmp.ne.s32.totalorder %s1287_s24, %s937_s12  ;;  %p942_p1 = scmp.lt.s32.totalorder %s1287_s24, %s1383_s5 }
 0x2be   : > { %p943_p8 = scmp.lt.s32.totalorder %s941_s28, %s937_s12 }
 0x2bf   : > { %p939_p13 = pnand %p938_p9, %p1174_p0 }
 0x2c0   : > { %p944_p4 = por %p943_p8, %p942_p1 }
 0x2c1   : > { %p940_p11 = pneg %p939_p13 }
 0x2c3   : > { %p945_p10 = pnand %p944_p4, %p940_p11 }
 0x2c5   : > { %948 = shalt.err (!%p945_p10)
}
 0x2c6   : > { %754 = dma.vmem_to_hbm [thread:$0]  (%p1174_p0), %s1281_s3, 128, %s1287_s24, %s1291_s27, %s1045_s20, %s1045_s20, %s1048_s9   ;;  %v463_v44 = vpop.permute.xlu1 %462 }
 0x2c7   : > { %s1325_s11 = scalar_lea.hbm %s1384_s6, %s1233_s16  ;;  %467 = vst.msk [vmem:[%s1276_s29 + $0x4] sm:$0xf] %vm449_vm2, %v463_v44  ;;  %s949_s17 = scalar_lea.vmem %s1319_s18, 128 }
 0x2c8   : > { %p950_p12 = scmp.ne.s32.totalorder %s1319_s18, %s949_s17  ;;  %s1050_s3 = smov [#allocation10]  }
 0x2c9   : > { %s953_s24 = sshll.u32 %s1050_s3, 4  ;;  %s954_s24 = int_to_ptr.vmem [resolvable:$false] %s953_s24 }
 0x2ca   : > { %p951_p3 = pnand %p950_p12, %p1174_p0  ;;  %s955_s12 = scalar_lea.vmem %s954_s24, 256 }
 0x2cb   : > { %p956_p7 = scmp.lt.s32.totalorder %s1319_s18, %s954_s24  ;;  %p957_p2 = scmp.lt.s32.totalorder %s955_s12, %s949_s17 }
 0x2cc   : > { %p952_p5 = pneg %p951_p3 }
 0x2cd   : > { %p958_p6 = por %p957_p2, %p956_p7 }
 0x2cf   : > { %p959_p9 = pnand %p958_p6, %p952_p5 }
 0x2d1   : > { %962 = shalt.err (!%p959_p9)
}
 0x2d2   : > { %s963_s16 = scalar_lea.hbm %s1325_s11, 128  ;;  %s967_s15 = scalar_lea.hbm %s1384_s6, 256 }
 0x2d3   : > { %p964_p13 = scmp.ne.s32.totalorder %s1325_s11, %s963_s16  ;;  %p968_p8 = scmp.lt.s32.totalorder %s1325_s11, %s1384_s6 }
 0x2d4   : > { %p969_p4 = scmp.lt.s32.totalorder %s967_s15, %s963_s16 }
 0x2d5   : > { %p965_p11 = pnand %p964_p13, %p1174_p0 }
 0x2d6   : > { %p970_p10 = por %p969_p4, %p968_p8 }
 0x2d7   : > { %p966_p1 = pneg %p965_p11 }
 0x2d9   : > { %p971_p12 = pnand %p970_p10, %p966_p1 }
 0x2db   : > { %974 = shalt.err (!%p971_p12)
}
 0x2dc   : > { %755 = dma.vmem_to_hbm [thread:$0]  (%p1174_p0), %s1319_s18, 128, %s1325_s11, %s1291_s27, %s1045_s20, %s1045_s20, %s1048_s9  }
 0x2dd PF: > { %s545_s14 = sand.u32 1, %s1017_s21   ;;  %p1407_p3 = scmp.ne.s32.totalorder %s1394_s30, 0 }
 0x2de   : > { %p1408_p5 = scmp.ge.s32.totalorder %s1037_s26, 2  ;;  %s546_s25 = scalar_lea.sflag [#allocation4], %s545_s14 }
 0x2e0   : > { %p768_p7 = pnand %p1408_p5, %p1407_p3 }
 0x2e2   : > { %p769_p2 = pneg %p768_p7 }
 0x2e4   : > { %1008 = dma.done.wait (%p769_p2), %s546_s25, 128  }
 0x2e5   : > { %1010 = vsyncadd (%p769_p2), %s546_s25, 4294967168  ;;  %s1409_s19 = sadd.s32 4294967294, %s1037_s26  }
 0x2e6   : > { %s554_s7 = sand.u32 1, %s1409_s19  }
 0x2e7   : > { %s555_s17 = scalar_lea.sflag [#allocation9], %s554_s7 }
 0x2e8   : > { %1012 = dma.done.wait (%p769_p2), %s555_s17, 256  }
 0x2e9   : > { %1014 = vsyncadd (%p769_p2), %s555_s17, 4294967040  ;;  %s27_s26 = sadd.s32 1, %s1037_s26   ;;  %s1410_s24 = sld [smem:[#allocation15_spill]] }
 0x2ea   : > { %p24_p0 = scmp.ge.s32.totalorder %s27_s26, 4   ;;  %s1411_s25 = sld [smem:[#allocation16_spill]] }
 0x2eb   : > { %s1412_s21 = smov %s1021_s22  ;;  %s1413_s22 = smov %s1025_s23 }
 0x2ec   : > { %s1414_s23 = smov %s1183_s10  ;;  %26 = sbr.rel (!%p24_p0) target bundleno = 11 (0xb), region = 117 }
 0x2f1   :  { %569 = vsyncpa [#allocation3], 1 }
 0x2f2   :  { %571 = vsyncpa [#allocation3 + $0x1], 1 }
 0x2f3   :  { %572 = vsyncpa [#allocation6], 1 }
 0x2f4   :  { %573 = vsyncpa [#allocation4], 1 }
 0x2f5   :  { %575 = vsyncpa [#allocation4 + $0x1], 1 }
 0x2f6   :  { %576 = vsyncpa [#allocation9], 1 }
 0x2f7   :  { %578 = vsyncpa [#allocation9 + $0x1], 1 }

</bundles_post_ra>
